<compile_context>
chip_gen: v7x
topology: tpu7x:2x2x1
jax: 0.10.0
libtpu: 0.0.40
codegen_flags: <defaults>
</compile_context>

<pallas_src>
import math

import jax
import jax.numpy as jnp
import numpy as np
from jax import lax
from jax.experimental import pallas as pl
from jax.experimental.pallas import tpu as pltpu


def _multi_encdec_kernel(x_ref, enc_ref, wqt_ref, bq_ref, wct_ref, bc_ref, out_ref):
    S, D = x_ref.shape
    HD = wqt_ref.shape[1]
    H = HD // D

    x = x_ref[...]                                                        # [S, D]

    # k / v do not depend on the head: compute once, reuse for all heads.
    k = jnp.dot(enc_ref[0], x, preferred_element_type=jnp.float32)        # [D, D]
    v = jnp.dot(enc_ref[1], x, preferred_element_type=jnp.float32)        # [D, D]

    # All heads' queries in one lane-dense matmul ([S, H*D]); the 1/sqrt(qk_size)
    # softmax scale is already folded into wqt / bq by the wrapper.
    q_all = (jnp.dot(x, wqt_ref[...], preferred_element_type=jnp.float32)
             + bq_ref[...])                                               # [S, H*D]

    # Contract last dims directly: q @ k^T and p @ v^T without in-kernel .T.
    cn = (((1,), (1,)), ((), ()))

    zs = []
    for h in range(H):  # static unroll; H is a trace-time constant
        q_h = q_all[:, h * D:(h + 1) * D]                                 # [S, D]
        s = lax.dot_general(q_h, k, cn, preferred_element_type=jnp.float32)
        # softmax along dim=1 (last axis of a 2-D tensor, matching torch)
        s = s - jnp.max(s, axis=-1, keepdims=True)
        p = jnp.exp(s)
        p = p * pl.reciprocal(jnp.sum(p, axis=-1, keepdims=True), approx=True)
        zs.append(lax.dot_general(p, v, cn, preferred_element_type=jnp.float32))

    zcat = jnp.concatenate(zs, axis=-1)                                   # [S, H*D]

    # Compress linear + bias, single lane-dense writeback.
    out_ref[...] = (jnp.dot(zcat, wct_ref[...], preferred_element_type=jnp.float32)
                    + bc_ref[...])


def multi_enc_dec_heads(x, enc_output, wq, bq, wc, bc):
    """x: [S, D]; enc_output: [2, D, S]; wq: [H, D, D]; bq: [H, D];
    wc: [D, H*D] (torch Linear weight, out x in); bc: [D]. Returns [S, D]."""
    H, D, _ = wq.shape
    S = x.shape[0]
    scale = 1.0 / math.sqrt(D)

    # Wq_all^T laid out [D_in, H*D_out] so the kernel needs no transpose; the
    # softmax scale is folded into the (static) weights/bias once, here.
    wqt = jnp.transpose(wq, (2, 0, 1)).reshape(D, H * D) * scale          # [D, H*D]
    bqr = bq.reshape(1, H * D) * scale                                    # [1, H*D]
    wct = jnp.transpose(wc)                                               # [H*D, D]
    bcr = bc.reshape(1, D)                                                # [1, D]

    # Everything fits comfortably in VMEM at these shapes -> single invocation,
    # whole arrays resident (no grid, no per-step overhead).
    # TODO(synk): for large S, add a "parallel" sequence-tile grid axis (v7x 2-TC
    # sharding) and re-derive block sizes / vmem_limit_bytes for 64 MiB VMEM.
    vmem_specs = [pl.BlockSpec(memory_space=pltpu.MemorySpace.VMEM) for _ in range(6)]
    return pl.pallas_call(
        _multi_encdec_kernel,
        out_shape=jax.ShapeDtypeStruct((S, D), jnp.float32),
        in_specs=vmem_specs,
        out_specs=pl.BlockSpec(memory_space=pltpu.MemorySpace.VMEM),
    )(x, enc_output, wqt, bqr, wct, bcr)


def ref_forward(x, enc_output, wq, bq, wc, bc):
    """Pure-JAX reference mirroring the PyTorch forward semantics."""
    H, D, _ = wq.shape
    zs = []
    for h in range(H):
        q = x @ wq[h].T + bq[h]
        k = enc_output[0] @ x
        v = enc_output[1] @ x
        e = (q @ k.T) / jnp.sqrt(jnp.float32(D))
        e = jax.nn.softmax(e, axis=1)
        zs.append(e @ v.T)
    zcat = jnp.concatenate(zs, axis=1)
    return zcat @ wc.T + bc


if __name__ == "__main__":
    # Small shapes consistent with the module: num_heads=4, seq=8,
    # x_size = qk_size = zv_size = 32 (tied by the module's matmul chain).
    H, S, D = 4, 8, 32

    key = jax.random.PRNGKey(0)
    kx, kenc, kwq, kbq, kwc, kbc = jax.random.split(key, 6)

    x = jax.random.normal(kx, (S, D), dtype=jnp.float32)
    enc_output = jax.random.normal(kenc, (2, D, S), dtype=jnp.float32) * 0.1

    # Deterministic parameter init (synthetic, nn.Linear-like scales).
    wq = jax.random.uniform(kwq, (H, D, D), jnp.float32, -1.0, 1.0) / math.sqrt(D)
    bq = jax.random.uniform(kbq, (H, D), jnp.float32, -1.0, 1.0) / math.sqrt(D)
    wc = jax.random.uniform(kwc, (D, H * D), jnp.float32, -1.0, 1.0) / math.sqrt(H * D)
    bc = jax.random.uniform(kbc, (D,), jnp.float32, -1.0, 1.0) / math.sqrt(H * D)

    out = multi_enc_dec_heads(x, enc_output, wq, bq, wc, bc)
    out = jax.block_until_ready(out)

    ref = ref_forward(x, enc_output, wq, bq, wc, bc)
    # Tolerance slightly relaxed for the approximate (EUP) softmax reciprocal.
    np.testing.assert_allclose(np.asarray(out), np.asarray(ref), rtol=2e-3, atol=2e-3)

    print("KERNEL_OK")
</pallas_src>

<mosaic_0001>
module attributes {stable_mosaic.version = 11 : i64} {
  func.func @_multi_encdec_kernel(%arg0: memref<8x32xf32, #tpu.memory_space<vmem>>, %arg1: memref<2x32x8xf32, #tpu.memory_space<vmem>>, %arg2: memref<32x128xf32, #tpu.memory_space<vmem>>, %arg3: memref<1x128xf32, #tpu.memory_space<vmem>>, %arg4: memref<128x32xf32, #tpu.memory_space<vmem>>, %arg5: memref<1x32xf32, #tpu.memory_space<vmem>>, %arg6: memref<8x32xf32, #tpu.memory_space<vmem>>) attributes {dimension_semantics = [], scalar_prefetch = 0 : i64, scratch_operands = 0 : i64, tpu.core_type = #tpu.core_type<tc>} {
    %c0 = arith.constant 0 : index
    %c0_0 = arith.constant 0 : index
    %0 = vector.load %arg0[%c0, %c0_0] : memref<8x32xf32, #tpu.memory_space<vmem>>, vector<8x32xf32>
    %c0_1 = arith.constant 0 : index
    %c0_2 = arith.constant 0 : index
    %c0_3 = arith.constant 0 : index
    %1 = vector.load %arg1[%c0_1, %c0_2, %c0_3] : memref<2x32x8xf32, #tpu.memory_space<vmem>>, vector<1x32x8xf32>
    %2 = vector.shape_cast %1 : vector<1x32x8xf32> to vector<32x8xf32>
    %cst = arith.constant dense<0.000000e+00> : vector<32x32xf32>
    %3 = tpu.matmul %2, %0, %cst {dimension_numbers = #tpu.dot_dimension_numbers<[1], [0], [0], [1], [0, 0, 1, 1], [], []>} : vector<32x8xf32>, vector<8x32xf32>, vector<32x32xf32> -> vector<32x32xf32>
    %c1 = arith.constant 1 : index
    %c0_4 = arith.constant 0 : index
    %c0_5 = arith.constant 0 : index
    %4 = vector.load %arg1[%c1, %c0_4, %c0_5] : memref<2x32x8xf32, #tpu.memory_space<vmem>>, vector<1x32x8xf32>
    %5 = vector.shape_cast %4 : vector<1x32x8xf32> to vector<32x8xf32>
    %cst_6 = arith.constant dense<0.000000e+00> : vector<32x32xf32>
    %6 = tpu.matmul %5, %0, %cst_6 {dimension_numbers = #tpu.dot_dimension_numbers<[1], [0], [0], [1], [0, 0, 1, 1], [], []>} : vector<32x8xf32>, vector<8x32xf32>, vector<32x32xf32> -> vector<32x32xf32>
    %c0_7 = arith.constant 0 : index
    %c0_8 = arith.constant 0 : index
    %7 = vector.load %arg2[%c0_7, %c0_8] : memref<32x128xf32, #tpu.memory_space<vmem>>, vector<32x128xf32>
    %cst_9 = arith.constant dense<0.000000e+00> : vector<8x128xf32>
    %8 = tpu.matmul %0, %7, %cst_9 {dimension_numbers = #tpu.dot_dimension_numbers<[1], [0], [0], [1], [0, 0, 1, 1], [], []>} : vector<8x32xf32>, vector<32x128xf32>, vector<8x128xf32> -> vector<8x128xf32>
    %c0_10 = arith.constant 0 : index
    %c0_11 = arith.constant 0 : index
    %9 = vector.load %arg3[%c0_10, %c0_11] : memref<1x128xf32, #tpu.memory_space<vmem>>, vector<1x128xf32>
    %10 = vector.broadcast %9 : vector<1x128xf32> to vector<8x128xf32>
    %11 = arith.addf %8, %10 : vector<8x128xf32>
    %12 = vector.extract_strided_slice %11 {offsets = [0, 0], sizes = [8, 32], strides = [1, 1]} : vector<8x128xf32> to vector<8x32xf32>
    %cst_12 = arith.constant dense<0.000000e+00> : vector<8x32xf32>
    %13 = tpu.matmul %12, %3, %cst_12 {dimension_numbers = #tpu.dot_dimension_numbers<[1], [1], [0], [0], [0, 0, 1, 0], [], []>} : vector<8x32xf32>, vector<32x32xf32>, vector<8x32xf32> -> vector<8x32xf32>
    %cst_13 = arith.constant dense<0xFF800000> : vector<8xf32>
    %14 = vector.multi_reduction <maximumf>, %13, %cst_13 [1] : vector<8x32xf32> to vector<8xf32>
    %15 = vector.shape_cast %14 : vector<8xf32> to vector<8x1xf32>
    %16 = vector.broadcast %15 : vector<8x1xf32> to vector<8x32xf32>
    %17 = arith.subf %13, %16 : vector<8x32xf32>
    %18 = math.exp %17 : vector<8x32xf32>
    %cst_14 = arith.constant dense<0.000000e+00> : vector<8xf32>
    %19 = vector.multi_reduction <add>, %18, %cst_14 [1] : vector<8x32xf32> to vector<8xf32>
    %20 = vector.shape_cast %19 : vector<8xf32> to vector<8x1xf32>
    %21 = tpu.reciprocal %20 {approx = true} : vector<8x1xf32> -> vector<8x1xf32>
    %22 = vector.broadcast %21 : vector<8x1xf32> to vector<8x32xf32>
    %23 = arith.mulf %18, %22 : vector<8x32xf32>
    %cst_15 = arith.constant dense<0.000000e+00> : vector<8x32xf32>
    %24 = tpu.matmul %23, %6, %cst_15 {dimension_numbers = #tpu.dot_dimension_numbers<[1], [1], [0], [0], [0, 0, 1, 0], [], []>} : vector<8x32xf32>, vector<32x32xf32>, vector<8x32xf32> -> vector<8x32xf32>
    %25 = vector.extract_strided_slice %11 {offsets = [0, 32], sizes = [8, 32], strides = [1, 1]} : vector<8x128xf32> to vector<8x32xf32>
    %cst_16 = arith.constant dense<0.000000e+00> : vector<8x32xf32>
    %26 = tpu.matmul %25, %3, %cst_16 {dimension_numbers = #tpu.dot_dimension_numbers<[1], [1], [0], [0], [0, 0, 1, 0], [], []>} : vector<8x32xf32>, vector<32x32xf32>, vector<8x32xf32> -> vector<8x32xf32>
    %cst_17 = arith.constant dense<0xFF800000> : vector<8xf32>
    %27 = vector.multi_reduction <maximumf>, %26, %cst_17 [1] : vector<8x32xf32> to vector<8xf32>
    %28 = vector.shape_cast %27 : vector<8xf32> to vector<8x1xf32>
    %29 = vector.broadcast %28 : vector<8x1xf32> to vector<8x32xf32>
    %30 = arith.subf %26, %29 : vector<8x32xf32>
    %31 = math.exp %30 : vector<8x32xf32>
    %cst_18 = arith.constant dense<0.000000e+00> : vector<8xf32>
    %32 = vector.multi_reduction <add>, %31, %cst_18 [1] : vector<8x32xf32> to vector<8xf32>
    %33 = vector.shape_cast %32 : vector<8xf32> to vector<8x1xf32>
    %34 = tpu.reciprocal %33 {approx = true} : vector<8x1xf32> -> vector<8x1xf32>
    %35 = vector.broadcast %34 : vector<8x1xf32> to vector<8x32xf32>
    %36 = arith.mulf %31, %35 : vector<8x32xf32>
    %cst_19 = arith.constant dense<0.000000e+00> : vector<8x32xf32>
    %37 = tpu.matmul %36, %6, %cst_19 {dimension_numbers = #tpu.dot_dimension_numbers<[1], [1], [0], [0], [0, 0, 1, 0], [], []>} : vector<8x32xf32>, vector<32x32xf32>, vector<8x32xf32> -> vector<8x32xf32>
    %38 = vector.extract_strided_slice %11 {offsets = [0, 64], sizes = [8, 32], strides = [1, 1]} : vector<8x128xf32> to vector<8x32xf32>
    %cst_20 = arith.constant dense<0.000000e+00> : vector<8x32xf32>
    %39 = tpu.matmul %38, %3, %cst_20 {dimension_numbers = #tpu.dot_dimension_numbers<[1], [1], [0], [0], [0, 0, 1, 0], [], []>} : vector<8x32xf32>, vector<32x32xf32>, vector<8x32xf32> -> vector<8x32xf32>
    %cst_21 = arith.constant dense<0xFF800000> : vector<8xf32>
    %40 = vector.multi_reduction <maximumf>, %39, %cst_21 [1] : vector<8x32xf32> to vector<8xf32>
    %41 = vector.shape_cast %40 : vector<8xf32> to vector<8x1xf32>
    %42 = vector.broadcast %41 : vector<8x1xf32> to vector<8x32xf32>
    %43 = arith.subf %39, %42 : vector<8x32xf32>
    %44 = math.exp %43 : vector<8x32xf32>
    %cst_22 = arith.constant dense<0.000000e+00> : vector<8xf32>
    %45 = vector.multi_reduction <add>, %44, %cst_22 [1] : vector<8x32xf32> to vector<8xf32>
    %46 = vector.shape_cast %45 : vector<8xf32> to vector<8x1xf32>
    %47 = tpu.reciprocal %46 {approx = true} : vector<8x1xf32> -> vector<8x1xf32>
    %48 = vector.broadcast %47 : vector<8x1xf32> to vector<8x32xf32>
    %49 = arith.mulf %44, %48 : vector<8x32xf32>
    %cst_23 = arith.constant dense<0.000000e+00> : vector<8x32xf32>
    %50 = tpu.matmul %49, %6, %cst_23 {dimension_numbers = #tpu.dot_dimension_numbers<[1], [1], [0], [0], [0, 0, 1, 0], [], []>} : vector<8x32xf32>, vector<32x32xf32>, vector<8x32xf32> -> vector<8x32xf32>
    %51 = vector.extract_strided_slice %11 {offsets = [0, 96], sizes = [8, 32], strides = [1, 1]} : vector<8x128xf32> to vector<8x32xf32>
    %cst_24 = arith.constant dense<0.000000e+00> : vector<8x32xf32>
    %52 = tpu.matmul %51, %3, %cst_24 {dimension_numbers = #tpu.dot_dimension_numbers<[1], [1], [0], [0], [0, 0, 1, 0], [], []>} : vector<8x32xf32>, vector<32x32xf32>, vector<8x32xf32> -> vector<8x32xf32>
    %cst_25 = arith.constant dense<0xFF800000> : vector<8xf32>
    %53 = vector.multi_reduction <maximumf>, %52, %cst_25 [1] : vector<8x32xf32> to vector<8xf32>
    %54 = vector.shape_cast %53 : vector<8xf32> to vector<8x1xf32>
    %55 = vector.broadcast %54 : vector<8x1xf32> to vector<8x32xf32>
    %56 = arith.subf %52, %55 : vector<8x32xf32>
    %57 = math.exp %56 : vector<8x32xf32>
    %cst_26 = arith.constant dense<0.000000e+00> : vector<8xf32>
    %58 = vector.multi_reduction <add>, %57, %cst_26 [1] : vector<8x32xf32> to vector<8xf32>
    %59 = vector.shape_cast %58 : vector<8xf32> to vector<8x1xf32>
    %60 = tpu.reciprocal %59 {approx = true} : vector<8x1xf32> -> vector<8x1xf32>
    %61 = vector.broadcast %60 : vector<8x1xf32> to vector<8x32xf32>
    %62 = arith.mulf %57, %61 : vector<8x32xf32>
    %cst_27 = arith.constant dense<0.000000e+00> : vector<8x32xf32>
    %63 = tpu.matmul %62, %6, %cst_27 {dimension_numbers = #tpu.dot_dimension_numbers<[1], [1], [0], [0], [0, 0, 1, 0], [], []>} : vector<8x32xf32>, vector<32x32xf32>, vector<8x32xf32> -> vector<8x32xf32>
    %64 = tpu.concatenate %24, %37, %50, %63 in 1 : vector<8x32xf32>, vector<8x32xf32>, vector<8x32xf32>, vector<8x32xf32> -> vector<8x128xf32>
    %c0_28 = arith.constant 0 : index
    %c0_29 = arith.constant 0 : index
    %65 = vector.load %arg4[%c0_28, %c0_29] : memref<128x32xf32, #tpu.memory_space<vmem>>, vector<128x32xf32>
    %cst_30 = arith.constant dense<0.000000e+00> : vector<8x32xf32>
    %66 = tpu.matmul %64, %65, %cst_30 {dimension_numbers = #tpu.dot_dimension_numbers<[1], [0], [0], [1], [0, 0, 1, 1], [], []>} : vector<8x128xf32>, vector<128x32xf32>, vector<8x32xf32> -> vector<8x32xf32>
    %c0_31 = arith.constant 0 : index
    %c0_32 = arith.constant 0 : index
    %67 = vector.load %arg5[%c0_31, %c0_32] : memref<1x32xf32, #tpu.memory_space<vmem>>, vector<1x32xf32>
    %68 = vector.broadcast %67 : vector<1x32xf32> to vector<8x32xf32>
    %69 = arith.addf %66, %68 : vector<8x32xf32>
    %c0_33 = arith.constant 0 : index
    %c0_34 = arith.constant 0 : index
    %70 = vector.load %arg6[%c0_33, %c0_34] : memref<8x32xf32, #tpu.memory_space<vmem>>, vector<8x32xf32>
    tpu.vector_store %arg6[%c0_33, %c0_34], %69 {strides = array<i32>} : memref<8x32xf32, #tpu.memory_space<vmem>>, vector<8x32xf32>,
    return
  }
}

</mosaic_0001>

<bundles_post_ra>
// kernel: tpu_custom_call.1
= control target key start
LH: loop header
LB: loop body
LE: loop exit
PB: predicated region body
PF: predicated region fallthrough
CT: control target
= control target key end

     0   :  { %vm29_vm0 = vcmask 64512   ;;  %v1512_v9 = vmov 0.0|0.0   ;;  %s1788_s0 = inlined_call_operand.vmem [shape: f32[8,32], index: 0, kind: input, shape index: {}]   ;;  %s1789_s1 = inlined_call_operand.vmem [shape: f32[2,32,8], index: 1, kind: input, shape index: {}]   ;;  %s1790_s2 = inlined_call_operand.vmem [shape: f32[32,128], index: 2, kind: input, shape index: {}]   ;;  %s1791_s3 = inlined_call_operand.vmem [shape: f32[1,128], index: 3, kind: input, shape index: {}]   ;;  %s1792_s4 = inlined_call_operand.vmem [shape: f32[128,32], index: 4, kind: input, shape index: {}]   ;;  %s1793_s5 = inlined_call_operand.vmem [shape: f32[1,32], index: 5, kind: input, shape index: {}]   ;;  %s1794_s6 = inlined_call_operand.hbm [shape: f32[8,32], index: 6, kind: output, shape index: {}]  }
   0x1   :  { %v24_v0 = vld [vmem:[%s1788_s0] sm:$0xff]  ;;  %v26_v2 = vld [vmem:[%s1789_s1 + $0x8] sm:$0xff]  ;;  %v27_v5 = vld [vmem:[%s1789_s1 + $0x10] sm:$0xff] }
   0x2   :  { %v25_v1 = vld [vmem:[%s1789_s1] sm:$0xff]  ;;  %1221 = vmatprep.subr.mxu0 %v24_v0  ;;  %v230_v4 = vld [vmem:[%s1790_s2 + $0x8] sm:$0xff]  ;;  %v231_v7 = vld [vmem:[%s1790_s2 + $0x10] sm:$0xff]  ;;  %1229 = vmatprep.subr.mxu1 %v24_v0 }
   0x3   :  { %1223 = vmatprep.mubr.msk.f32.mxu0 %vm29_vm0, %v25_v1  ;;  %v229_v3 = vld [vmem:[%s1790_s2] sm:$0xff]  ;;  %1222 = vmatpush3.msra.mxu0 %v24_v0  ;;  %v232_v8 = vld [vmem:[%s1790_s2 + $0x18] sm:$0xff] }
   0x4   :  { %v1372_v6 = vpack.c.bf16 %v230_v4, %v229_v3  ;;  %1224 = vmatmul.mubr.msk.f32.vlgmr.msra.gmra.mrb[0].mxu0 %vm29_vm0, %v26_v2  ;;  %1371 = vmatprep.subr.bf16.mxu0 %v1512_v9 }
   0x5   :  { %11 = vsyncpa [#allocation3], 0  ;;  %1226 = vmatprep.mubr.msk.f32.mxu0 %vm29_vm0, %v27_v5  ;;  %v28_v10 = vld [vmem:[%s1789_s1 + $0x18] sm:$0xff]  ;;  %v1375_v11 = vpack.c.bf16 %v232_v8, %v231_v7  ;;  %1230 = vmatpush3.msra.mxu1 %v24_v0  ;;  %vm1513_vm1 = vmmov 0   ;;  %v1514_v12 = vmov 0.0   ;;  %vm240_vm2 = vcmask 261120  }
   0x6   :  { %1373 = vmatpush3.bf16.msra.mxu0 %v1372_v6  ;;  %1393 = vmatprep.subr.bf16.mxu1 %v1512_v9  ;;  %v1098_v13 = vld [vmem:[%s1789_s1 + $0x20] sm:$0xff]  ;;  %v1099_v14 = vld [vmem:[%s1789_s1 + $0x28] sm:$0xff]  ;;  %v1100_v15 = vld [vmem:[%s1789_s1 + $0x30] sm:$0xff]  ;;  %s1515_s22 = smov 96   ;;  %s1516_s23 = smov 32   ;;  %vm982_vm4 = vcmask 523264  }
   0x7   :  { %1374 = vmatprep.subr.bf16.mxu0 %v1512_v9  ;;  %1231 = vmatprep.mubr.msk.f32.mxu1 %vm29_vm0, %v1098_v13  ;;  %v1101_v16 = vld [vmem:[%s1789_s1 + $0x38] sm:$0xff]  ;;  %vm1614_vm3 = vmpackc.low %vm240_vm2, %vm240_vm2  ;;  %v1106_v24 = vld [vmem:[%s1791_s3] ss:$0 sm:$0xff]  ;;  %s1517_s3 = smov 64   ;;  %vm984_vm5 = vcmask 785408  }
   0x8   :  { %1227 = vmatmul.mubr.msk.f32.gmra.mrb[2].mxu0 %vm29_vm0, %v28_v10  ;;  %1232 = vmatmul.mubr.msk.f32.vlgmr.msra.gmra.mrb[0].mxu1 %vm29_vm0, %v1099_v14  ;;  %v988_v19 = vld [vmem:[%s1792_s4 + $0x10] sm:$0xff] }
   0x9   :  { %1245 = vmatprep.mubr.msk.f32.mxu0 %vm1513_vm1, %v1514_v12  ;;  %1234 = vmatprep.mubr.msk.f32.mxu1 %vm29_vm0, %v1100_v15 }
   0xa   :  { %1376 = vmatpush3.bf16.msra.mxu0 %v1375_v11 }
   0xb   :  { %1377 = vmatprep.subr.bf16.mxu0 %v1512_v9 }
   0xc   :  { %1235 = vmatmul.mubr.msk.f32.gmra.mrb[2].mxu1 %vm29_vm0, %v1101_v16 }
   0xd   :  { %1246 = vmatmul.mubr.msk.f32.vlgmr.msra.gmra.mrb[4].mxu0 %vm240_vm2, %v24_v0  ;;  %1278 = vmatprep.mubr.msk.f32.mxu1 %vm1513_vm1, %v1514_v12 }
   0xe   :  { %1256 = vmatprep.mubr.msk.f32.mxu0 %vm1513_vm1, %v1514_v12 }
  0xd7   :  { %v1225_v17 = vpop.f32.mrb[0].mxu0 }
  0xd8   :  { %v108_v18 = vpop.f32.mrb[1].mxu0 }
  0xd9   :  { %v1378_v20 = vpack.c.bf16 %v1225_v17, %v108_v18 }
  0xdb   :  { %v1228_v21 = vpop.f32.mrb[2].mxu0  ;;  %1380 = vmatpush3.bf16.xpose.msk.msra.mxu0 %vm1614_vm3, %v1378_v20  ;;  %1396 = vmatpush3.bf16.xpose.msk.msra.mxu1 %vm1614_vm3, %v1378_v20  ;;  %v1233_v28 = vpop.f32.mrb[0].mxu1 }
  0xdc   :  { %v118_v22 = vpop.f32.mrb[3].mxu0  ;;  %1381 = vmatprep.subr.bf16.mxu0 %v1512_v9  ;;  %1397 = vmatprep.subr.bf16.mxu1 %v1512_v9  ;;  %v210_v29 = vpop.f32.mrb[1].mxu1 }
  0xdd   :  { %v1382_v23 = vpack.c.bf16 %v1228_v21, %v118_v22  ;;  %v1639_v30 = vpack.c.bf16 %v1233_v28, %v210_v29  ;;  %v986_v22 = vld [vmem:[%s1792_s4] sm:$0xff]  ;;  %v992_v29 = vld [vmem:[%s1792_s4 + $0x30] sm:$0xff] }
  0xdf   :  { %v1236_v31 = vpop.f32.mrb[2].mxu1 }
  0xe0   :  { %v310_v25 = vpop.f32.mrb[4].mxu0  ;;  %v220_v32 = vpop.f32.mrb[3].mxu1 }
  0xe1   :  { %v311_v26 = vadd.f32 %v1106_v24, %v310_v25  ;;  %v1247_v27 = vpop.f32.mrb[5].mxu0  ;;  %v1644_v33 = vpack.c.bf16 %v1236_v31, %v220_v32  ;;  %v989_v24 = vld [vmem:[%s1792_s4 + $0x18] sm:$0xff] }
  0xe2   :  { %v1445_v25 = vpack.c.bf16 %v989_v24, %v988_v19  ;;  %v991_v27 = vld [vmem:[%s1792_s4 + $0x28] sm:$0xff] }
  0xe3   :  { %495 = vrot.lane.b32.xlu0 %v311_v26, %s1515_s22  ;;  %811 = vrot.lane.b32.xlu1 %v311_v26, %s1516_s23 }
  0xe4   :  { %1384 = vmatpush3.bf16.xpose.msk.msra.mxu0 %vm1614_vm3, %v1382_v23  ;;  %1400 = vmatpush3.bf16.xpose.msk.msra.mxu1 %vm1614_vm3, %v1382_v23 }
  0xe5   :  { %1409 = vmatprep.subr.bf16.mxu1 %v1512_v9  ;;  %1385 = vmatprep.subr.bf16.mxu0 %v1512_v9 }
  0xe7   :  { %653 = vrot.lane.b32.xlu0 %v311_v26, %s1517_s3 }
  0xeb   :  { %1257 = vmatmul.mubr.msk.f32.vlgmr.msra.gmra.mrb[6].mxu0 %vm240_vm2, %v311_v26  ;;  %v990_v26 = vld [vmem:[%s1792_s4 + $0x20] sm:$0xff] }
  0xec   :  { %1267 = vmatprep.mubr.msk.f32.mxu0 %vm1513_vm1, %v1514_v12  ;;  %1388 = vmatpush3.bf16.xpose.msk.msra.mxu0 %vm1614_vm3, %v1639_v30  ;;  %v1448_v28 = vpack.c.bf16 %v991_v27, %v990_v26 }
  0xed   :  { %1389 = vmatprep.subr.bf16.mxu0 %v1512_v9 }
  0xf4   :  { %1392 = vmatpush3.bf16.xpose.msk.msra.mxu0 %vm1614_vm3, %v1644_v33 }
  0xf5   :  { %1401 = vmatprep.subr.bf16.mxu0 %v1512_v9 }
 0x155   :  { %v496_v34 = vpop.permute.xlu0 %495  ;;  %v812_v36 = vpop.permute.xlu1 %811 }
 0x156   :  { %1279 = vmatmul.mubr.msk.f32.vlgmr.msra.gmra.mrb[4].mxu1 %vm240_vm2, %v496_v34  ;;  %v994_v34 = vld [vmem:[%s1792_s4 + $0x40] sm:$0xff] }
 0x157   :  { %1412 = vmatpush3.bf16.xpose.msk.msra.mxu1 %vm1614_vm3, %v1378_v20  ;;  %1300 = vmatprep.mubr.msk.f32.mxu1 %vm1513_vm1, %v1514_v12 }
 0x158   :  { %1413 = vmatprep.subr.bf16.mxu1 %v1512_v9 }
 0x159   :  { %v654_v35 = vpop.permute.xlu0 %653 }
 0x15f   :  { %1416 = vmatpush3.bf16.xpose.msk.msra.mxu1 %vm1614_vm3, %v1382_v23 }
 0x160   :  { %1425 = vmatprep.subr.bf16.mxu1 %v1512_v9 }
 0x166   :  { %1301 = vmatmul.mubr.msk.f32.vlgmr.msra.gmra.mrb[6].mxu1 %vm240_vm2, %v654_v35  ;;  %v995_v35 = vld [vmem:[%s1792_s4 + $0x48] sm:$0xff] }
 0x167   :  { %1428 = vmatpush3.bf16.xpose.msk.msra.mxu1 %vm1614_vm3, %v1378_v20  ;;  %1322 = vmatprep.mubr.msk.f32.mxu1 %vm1513_vm1, %v1514_v12 }
 0x168   :  { %1429 = vmatprep.subr.bf16.mxu1 %v1512_v9 }
 0x16f   :  { %1432 = vmatpush3.bf16.xpose.msk.msra.mxu1 %vm1614_vm3, %v1382_v23 }
 0x170   :  { %1441 = vmatprep.subr.bf16.mxu1 %v1512_v9 }
 0x176   :  { %1323 = vmatmul.mubr.msk.f32.vlgmr.msra.gmra.mrb[8].mxu1 %vm240_vm2, %v812_v36  ;;  %v1454_v36 = vpack.c.bf16 %v995_v35, %v994_v34 }
 0x177   :  { %1368 = vmatprep.mubr.msk.f32.mxu1 %vm1513_vm1, %v1514_v12 }
 0x1be   :  { %v395_v37 = vpop.f32.mrb[6].mxu0 }
 0x1bf   :  { %v1258_v38 = vpop.f32.mrb[7].mxu0  ;;  %v399_v39 = vsel %vm240_vm2, %v395_v37, -inf }
 0x1c0   :  { %400 = vmax.xlane.f32.xlu1 %v399_v39  ;;  %v997_v38 = vld [vmem:[%s1792_s4 + $0x58] sm:$0xff] }
 0x229   :  { %v565_v40 = vpop.f32.mrb[4].mxu1 }
 0x22a   :  { %v1280_v41 = vpop.f32.mrb[5].mxu1  ;;  %v569_v42 = vsel %vm240_vm2, %v565_v40, -inf }
 0x22b   :  { %570 = vmax.xlane.f32.xlu0 %v569_v42  ;;  %v999_v41 = vld [vmem:[%s1792_s4 + $0x68] sm:$0xff] }
 0x239   :  { %v723_v43 = vpop.f32.mrb[6].mxu1 }
 0x23a   :  { %v1302_v44 = vpop.f32.mrb[7].mxu1  ;;  %v727_v45 = vsel %vm240_vm2, %v723_v43, -inf }
 0x23b   :  { %728 = vmax.xlane.f32.xlu0 %v727_v45  ;;  %v1001_v44 = vld [vmem:[%s1792_s4 + $0x78] sm:$0xff] }
 0x249   :  { %v881_v46 = vpop.f32.mrb[8].mxu1 }
 0x24a   :  { %v1324_v47 = vpop.f32.mrb[9].mxu1  ;;  %v885_v48 = vsel %vm240_vm2, %v881_v46, -inf }
 0x24b   :  { %886 = vmax.xlane.f32.xlu1 %v885_v48 }
 0x24d   :  { %v401_v49 = vpop.xlane.xlu1 %400 }
 0x24e   :  { %v402_v50 = vsub.f32 %v395_v37, %v401_v49  ;;  %v996_v37 = vld [vmem:[%s1792_s4 + $0x50] sm:$0xff] }
 0x24f   :  { %v1457_v39 = vpack.c.bf16 %v997_v38, %v996_v37 }
 0x250   :  { %v403_v51 = vmul.f32 1.442695, %v402_v50 }
 0x252   :  { %1472 = vpow2.f32 %v403_v51 }
 0x25c   :  { %v1473_v52 = vpop.eup %1472 }
 0x25d   :  { %v405_v53 = vsel %vm240_vm2, %v1473_v52, 0.0 }
 0x25e   :  { %406 = vadd.xlane.f32.xlu0 %v405_v53 }
 0x2b8   :  { %v571_v54 = vpop.xlane.xlu0 %570 }
 0x2b9   :  { %v572_v55 = vsub.f32 %v565_v40, %v571_v54  ;;  %v998_v40 = vld [vmem:[%s1792_s4 + $0x60] sm:$0xff] }
 0x2ba   :  { %v1460_v42 = vpack.c.bf16 %v999_v41, %v998_v40 }
 0x2bb   :  { %v573_v56 = vmul.f32 1.442695, %v572_v55 }
 0x2bd   :  { %1474 = vpow2.f32 %v573_v56 }
 0x2c7   :  { %v1475_v57 = vpop.eup %1474 }
 0x2c8   :  { %v729_v58 = vpop.xlane.xlu0 %728  ;;  %v575_v59 = vsel %vm240_vm2, %v1475_v57, 0.0 }
 0x2c9   :  { %v730_v60 = vsub.f32 %v723_v43, %v729_v58  ;;  %576 = vadd.xlane.f32.xlu1 %v575_v59  ;;  %v1000_v43 = vld [vmem:[%s1792_s4 + $0x70] sm:$0xff] }
 0x2ca   :  { %v1463_v45 = vpack.c.bf16 %v1001_v44, %v1000_v43 }
 0x2cb   :  { %v731_v61 = vmul.f32 1.442695, %v730_v60 }
 0x2cd   :  { %1476 = vpow2.f32 %v731_v61 }
 0x2d7   :  { %v1477_v62 = vpop.eup %1476 }
 0x2d8   :  { %v887_v63 = vpop.xlane.xlu1 %886  ;;  %v733_v0 = vsel %vm240_vm2, %v1477_v62, 0.0 }
 0x2d9   :  { %v888_v1 = vsub.f32 %v881_v46, %v887_v63  ;;  %734 = vadd.xlane.f32.xlu0 %v733_v0 }
 0x2db   :  { %v889_v2 = vmul.f32 1.442695, %v888_v1 }
 0x2dd   :  { %1478 = vpow2.f32 %v889_v2 }
 0x2e7   :  { %v1479_v3 = vpop.eup %1478 }
 0x2e8   :  { %v891_v4 = vsel %vm240_vm2, %v1479_v3, 0.0 }
 0x2e9   :  { %892 = vadd.xlane.f32.xlu1 %v891_v4 }
 0x2eb   :  { %v407_v5 = vpop.xlane.xlu0 %406 }
 0x2ec   :  { %1480 = vrcp.f32 %v407_v5 }
 0x2f6   :  { %v1481_v6 = vpop.eup %1480 }
 0x2f7   :  { %v409_v7 = vmul.f32 %v1481_v6, %v1473_v52 }
 0x2f9   :  { %1268 = vmatmul.mubr.msk.f32.vlgmr.msra.gmra.mrb[8].mxu0 %vm240_vm2, %v409_v7 }
 0x2fa   :  { %1404 = vmatpush3.bf16.xpose.msk.msra.mxu0 %vm1614_vm3, %v1639_v30  ;;  %1289 = vmatprep.mubr.msk.f32.mxu0 %vm1513_vm1, %v1514_v12 }
 0x2fb   :  { %1405 = vmatprep.subr.bf16.mxu0 %v1512_v9 }
 0x302   :  { %1408 = vmatpush3.bf16.xpose.msk.msra.mxu0 %vm1614_vm3, %v1644_v33 }
 0x303   :  { %1417 = vmatprep.subr.bf16.mxu0 %v1512_v9 }
 0x356   :  { %v577_v8 = vpop.xlane.xlu1 %576 }
 0x357   :  { %1482 = vrcp.f32 %v577_v8 }
 0x361   :  { %v1483_v10 = vpop.eup %1482 }
 0x362   :  { %v579_v11 = vmul.f32 %v1483_v10, %v1475_v57 }
 0x364   :  { %1290 = vmatmul.mubr.msk.f32.vlgmr.msra.gmra.mrb[10].mxu0 %vm240_vm2, %v579_v11 }
 0x365   :  { %1420 = vmatpush3.bf16.xpose.msk.msra.mxu0 %vm1614_vm3, %v1639_v30  ;;  %1311 = vmatprep.mubr.msk.f32.mxu0 %vm1513_vm1, %v1514_v12 }
 0x366   :  { %v735_v13 = vpop.xlane.xlu0 %734  ;;  %1421 = vmatprep.subr.bf16.mxu0 %v1512_v9 }
 0x367   :  { %1484 = vrcp.f32 %v735_v13 }
 0x36d   :  { %1424 = vmatpush3.bf16.xpose.msk.msra.mxu0 %vm1614_vm3, %v1644_v33 }
 0x36e   :  { %1433 = vmatprep.subr.bf16.mxu0 %v1512_v9 }
 0x371   :  { %v1485_v14 = vpop.eup %1484 }
 0x372   :  { %v737_v15 = vmul.f32 %v1485_v14, %v1477_v62 }
 0x374   :  { %1312 = vmatmul.mubr.msk.f32.vlgmr.msra.gmra.mrb[12].mxu0 %vm240_vm2, %v737_v15 }
 0x375   :  { %1436 = vmatpush3.bf16.xpose.msk.msra.mxu0 %vm1614_vm3, %v1639_v30  ;;  %1333 = vmatprep.mubr.msk.f32.mxu0 %vm1513_vm1, %v1514_v12  ;;  %v987_v12 = vld [vmem:[%s1792_s4 + $0x8] sm:$0xff]  ;;  %v993_v30 = vld [vmem:[%s1792_s4 + $0x38] sm:$0xff] }
 0x376   :  { %v893_v16 = vpop.xlane.xlu1 %892  ;;  %1437 = vmatprep.subr.bf16.mxu0 %v1512_v9  ;;  %v1442_v23 = vpack.c.bf16 %v987_v12, %v986_v22  ;;  %v1451_v31 = vpack.c.bf16 %v993_v30, %v992_v29 }
 0x377   :  { %1486 = vrcp.f32 %v893_v16 }
 0x378   :  { %1443 = vmatpush3.bf16.msra.mxu1 %v1442_v23 }
 0x379   :  { %1444 = vmatprep.subr.bf16.mxu1 %v1512_v9 }
 0x37c   :  { %1446 = vmatpush3.bf16.msra.mxu1 %v1445_v25 }
 0x37d   :  { %1440 = vmatpush3.bf16.xpose.msk.msra.mxu0 %vm1614_vm3, %v1644_v33  ;;  %1447 = vmatprep.subr.bf16.mxu1 %v1512_v9 }
 0x380   :  { %1449 = vmatpush3.bf16.msra.mxu1 %v1448_v28 }
 0x381   :  { %v1487_v17 = vpop.eup %1486  ;;  %1450 = vmatprep.subr.bf16.mxu1 %v1512_v9 }
 0x382   :  { %v895_v18 = vmul.f32 %v1487_v17, %v1479_v3 }
 0x384   :  { %1334 = vmatmul.mubr.msk.f32.vlgmr.msra.gmra.mrb[14].mxu0 %vm240_vm2, %v895_v18  ;;  %1452 = vmatpush3.bf16.msra.mxu1 %v1451_v31 }
 0x385   :  { %1453 = vmatprep.subr.bf16.mxu1 %v1512_v9 }
 0x388   :  { %1455 = vmatpush3.bf16.msra.mxu1 %v1454_v36 }
 0x389   :  { %1456 = vmatprep.subr.bf16.mxu1 %v1512_v9 }
 0x38c   :  { %1458 = vmatpush3.bf16.msra.mxu1 %v1457_v39 }
 0x38d   :  { %1459 = vmatprep.subr.bf16.mxu1 %v1512_v9 }
 0x390   :  { %1461 = vmatpush3.bf16.msra.mxu1 %v1460_v42 }
 0x391   :  { %1462 = vmatprep.subr.bf16.mxu1 %v1512_v9  ;;  %v1148_v9 = vld [vmem:[%s1793_s5] ss:$0 sm:$0xff] }
 0x394   :  { %1464 = vmatpush3.bf16.msra.mxu1 %v1463_v45 }
 0x3cc   :  { %v491_v20 = vpop.f32.mrb[8].mxu0 }
 0x3cd   :  { %v1269_v21 = vpop.f32.mrb[9].mxu0 }
 0x437   :  { %v649_v32 = vpop.f32.mrb[10].mxu0 }
 0x438   :  { %970 = vrot.lane.b32.xlu0 %v649_v32, %s1516_s23  ;;  %v1291_v33 = vpop.f32.mrb[11].mxu0 }
 0x447   :  { %v807_v46 = vpop.f32.mrb[12].mxu0 }
 0x448   :  { %974 = vrot.lane.b32.xlu1 %v807_v46, %s1517_s3  ;;  %v1313_v47 = vpop.f32.mrb[13].mxu0  ;;  %s1518_s3 = smov [#allocation2]  }
 0x449   :  { %s1086_s0 = sshll.u32 %s1518_s3, 4  ;;  %s1087_s0 = int_to_ptr.vmem [resolvable:$true] %s1086_s0 }
 0x44a   :  { %p1493_p1 = scmp.lt.s32.totalorder %s1087_s0, %s1087_s0 }
 0x457   :  { %v965_v48 = vpop.f32.mrb[14].mxu0 }
 0x458   :  { %978 = vrot.lane.b32.xlu1 %v965_v48, %s1515_s22  ;;  %v1335_v49 = vpop.f32.mrb[15].mxu0  ;;  %s1488_s22 = scalar_lea.vmem %s1087_s0, 128 }
 0x459   :  { %p1489_p0 = scmp.ne.s32.totalorder %s1087_s0, %s1488_s22  ;;  %p1494_p2 = scmp.lt.s32.totalorder %s1488_s22, %s1488_s22 }
 0x45b   :  { %p1495_p3 = por %p1494_p2, %p1493_p1 }
 0x45d   :  { %p1496_p4 = pnand %p1495_p3, %p1489_p0 }
 0x4aa   :  { %v971_v50 = vpop.permute.xlu0 %970 }
 0x4ab   :  { %v981_v52 = vsel %vm240_vm2, %v491_v20, %v971_v50 }
 0x4ba   :  { %v975_v51 = vpop.permute.xlu1 %974 }
 0x4bb   :  { %v983_v53 = vsel %vm982_vm4, %v981_v52, %v975_v51 }
 0x4ca   :  { %v979_v54 = vpop.permute.xlu1 %978 }
 0x4cb   :  { %v985_v55 = vsel %vm984_vm5, %v983_v53, %v979_v54 }
 0x4cc   :  { %1369 = vmatmul.mubr.f32.vlgmr.msra.gmra.mrb[10].mxu1 %v985_v55 }
 0x59f   :  { %v1075_v56 = vpop.f32.mrb[10].mxu1 }
 0x5a0   :  { %v1076_v57 = vadd.f32 %v1148_v9, %v1075_v56  ;;  %v1370_v58 = vpop.f32.mrb[11].mxu1 }
 0x5a2   :  { %1079 = vst.msk [vmem:[#allocation2] sm:$0xff] %vm240_vm2, %v1076_v57 }
 0x5a3   :  { %1499 = shalt.err (!%p1496_p4)
}
 0x5a4   :  { %s1500_s9 = scalar_lea.hbm %s1794_s6, 128 }
 0x5a5   :  { %p1501_p5 = scmp.ne.s32.totalorder %s1794_s6, %s1500_s9  ;;  %p1504_p6 = scmp.lt.u32.totalorder %s1500_s9, %s1794_s6 }
 0x5a7   :  { %p1506_p7 = pnand %p1504_p6, %p1501_p5 }
 0x5a9   :  { %1509 = shalt.err (!%p1506_p7)
}
 0x5aa   :  { %1089 = dma.vmem_to_hbm [thread:$0]  %s1087_s0, 128, %s1794_s6, [#allocation3]  }
 0x5ab   :  { %1510 = dma.done.wait [#allocation3], 128  }
 0x5ac   :  { %1511 = vsyncadd [#allocation3], 4294967168 }
 0x5ad   :  { %1093 = vsyncpa [#allocation3], 1 }

</bundles_post_ra>
